<compile_context>
chip_gen: v7x
topology: tpu7x:2x2x1
jax: 0.10.0
libtpu: 0.0.40
codegen_flags: <defaults>
</compile_context>

<pallas_src>
import jax
import jax.numpy as jnp
from jax import lax
from jax.experimental import pallas as pl
from jax.experimental.pallas import tpu as pltpu


def lstm_tagger_kernel(x_ref, p_ref, wfc_ref, bfc_ref, out_ref, xg_ref, hs_ref):
    """Whole LSTM + fc head in one kernel invocation.

    x_ref   : (S*B, D)     inputs, time-major rows (row index = t*B + b)
    p_ref   : (D+H+1, 4H)  packed [W_ih^T ; W_hh^T ; b_ih+b_hh], g cols ×2
    wfc_ref : (1, H)       fc weight (row vector)
    bfc_ref : (1, 1)       fc bias (SMEM scalar)
    out_ref : (S, B)       tag logits, written once at the end
    xg_ref  : (S*B, 4H)    VMEM scratch: all-timestep input projections
    hs_ref  : (S, B, H)    VMEM scratch holding every h_t
    """
    S, B = out_ref.shape
    D = x_ref.shape[1]
    H = hs_ref.shape[2]
    H4 = 4 * H

    # ---- hoisted prologue (off the recurrent critical path) ----------------
    wih = p_ref[0:D, :]                      # (D, 4H)   static slice
    whh = p_ref[D:D + H, :]                  # (H, 4H)
    b = p_ref[D + H:D + H + 1, :]            # (1, 4H)

    # One MXU pass for every time step's input projection; bias folded in.
    xg_ref[...] = (jnp.dot(x_ref[...], wih,
                           preferred_element_type=jnp.float32) + b)

    # g-gate lane mask + hoisted fixup constants: since the g columns were
    # pre-scaled by 2, tanh(z) = 2*sigmoid(2z) - 1 = sig*2 - 1 on that block.
    lane = lax.broadcasted_iota(jnp.int32, (B, H4), 1)
    g_mask = (lane >= 2 * H) & (lane < 3 * H)
    fix_scale = jnp.where(g_mask, 2.0, 1.0).astype(jnp.float32)   # (B, 4H)
    fix_off = jnp.where(g_mask, 1.0, 0.0).astype(jnp.float32)     # (B, 4H)

    h = jnp.zeros((B, H), jnp.float32)
    c = jnp.zeros((B, H), jnp.float32)

    # ---- serial recurrence: statically unrolled, one matmul + one EUP pass -
    for t in range(S):
        gates = xg_ref[t * B:(t + 1) * B, :] + jnp.dot(
            h, whh, preferred_element_type=jnp.float32)           # (B, 4H)
        sig = jax.nn.sigmoid(gates)          # single whole-vreg EUP pass
        act = sig * fix_scale - fix_off      # g block -> tanh, i/f/o -> sigmoid
        i_g = act[:, 0 * H:1 * H]
        f_g = act[:, 1 * H:2 * H]
        g_g = act[:, 2 * H:3 * H]
        o_g = act[:, 3 * H:4 * H]
        c = f_g * c + i_g * g_g
        h = o_g * jnp.tanh(c)
        hs_ref[t] = h        # not on the h/c dependency chain -> overlappable

    # ---- fc head once, off the critical path (VPU mult + lane reduce) ------
    wfc = wfc_ref[...].reshape(1, 1, H)
    tags = jnp.sum(hs_ref[...] * wfc, axis=-1) + bfc_ref[0, 0]    # (S, B)
    out_ref[...] = tags


def pack_params(params):
    """Pack W_ih^T / W_hh^T / folded bias into one slab; pre-scale g cols by 2.

    Doubling is exact in floating point (exponent shift), so the kernel's
    sigmoid(2z) path is bit-equivalent to 2*(original pre-activation).
    """
    H = params["w_hh_t"].shape[0]
    packed = jnp.concatenate(
        [params["w_ih_t"], params["w_hh_t"], params["b"]], axis=0)  # (D+H+1,4H)
    col = jnp.arange(4 * H)
    g_col = (col >= 2 * H) & (col < 3 * H)
    return jnp.where(g_col[None, :], packed * 2.0, packed)


@jax.jit
def lstm_tagger_forward(inputs, packed_params, w_fc_row, b_fc):
    """inputs: (batch, seq, input_dim) float32 -> tags (batch, seq, 1)."""
    B, S, D = inputs.shape
    H = packed_params.shape[1] // 4

    # Time-major and flattened so the kernel can do one big input projection.
    x_td = jnp.transpose(inputs, (1, 0, 2)).reshape(S * B, D)

    vmem = pl.BlockSpec(memory_space=pltpu.MemorySpace.VMEM)
    smem = pl.BlockSpec(memory_space=pltpu.MemorySpace.SMEM)

    out_sb = pl.pallas_call(
        lstm_tagger_kernel,
        out_shape=jax.ShapeDtypeStruct((S, B), jnp.float32),
        in_specs=[vmem, vmem, vmem, smem],
        out_specs=vmem,
        scratch_shapes=[pltpu.VMEM((S * B, 4 * H), jnp.float32),
                        pltpu.VMEM((S, B, H), jnp.float32)],
    )(x_td, packed_params, w_fc_row, b_fc)

    return jnp.transpose(out_sb)[..., None]     # (B, S, 1)


def init_params(key, input_dim, hidden_dim):
    """Deterministic init mirroring nn.LSTM / nn.Linear (U(-k, k), k=1/sqrt(H))."""
    ks = jax.random.split(key, 6)
    k = 1.0 / jnp.sqrt(hidden_dim)
    w_ih = jax.random.uniform(ks[0], (4 * hidden_dim, input_dim), jnp.float32, -k, k)
    w_hh = jax.random.uniform(ks[1], (4 * hidden_dim, hidden_dim), jnp.float32, -k, k)
    b_ih = jax.random.uniform(ks[2], (4 * hidden_dim,), jnp.float32, -k, k)
    b_hh = jax.random.uniform(ks[3], (4 * hidden_dim,), jnp.float32, -k, k)
    w_fc = jax.random.uniform(ks[4], (1, hidden_dim), jnp.float32, -k, k)
    b_fc = jax.random.uniform(ks[5], (1,), jnp.float32, -k, k)
    return {
        "w_ih_t": w_ih.T,                        # (D, 4H)
        "w_hh_t": w_hh.T,                        # (H, 4H)
        "b": (b_ih + b_hh).reshape(1, -1),       # (1, 4H)
        "w_fc_row": w_fc,                        # (1, H)
        "b_fc": b_fc.reshape(1, 1),              # (1, 1)
    }


def reference_forward(inputs, params):
    """Pure-JAX reference (unscaled params, classic tanh path)."""
    B, S, D = inputs.shape
    H = params["w_hh_t"].shape[0]

    def step(carry, x_t):
        h, c = carry
        gates = x_t @ params["w_ih_t"] + h @ params["w_hh_t"] + params["b"]
        i = jax.nn.sigmoid(gates[:, 0 * H:1 * H])
        f = jax.nn.sigmoid(gates[:, 1 * H:2 * H])
        g = jnp.tanh(gates[:, 2 * H:3 * H])
        o = jax.nn.sigmoid(gates[:, 3 * H:4 * H])
        c = f * c + i * g
        h = o * jnp.tanh(c)
        return (h, c), h

    h0 = jnp.zeros((B, H), jnp.float32)
    c0 = jnp.zeros((B, H), jnp.float32)
    _, hs = lax.scan(step, (h0, c0), jnp.transpose(inputs, (1, 0, 2)))
    out = jnp.transpose(hs, (1, 0, 2))                              # (B, S, H)
    tags = jnp.sum(out * params["w_fc_row"].reshape(1, 1, H), axis=-1,
                   keepdims=True) + params["b_fc"].reshape(1, 1, 1)
    return tags


if __name__ == "__main__":
    batch_size, seq_len, input_dim, hidden_dim = 8, 8, 16, 32

    key = jax.random.PRNGKey(0)
    k_in, k_param = jax.random.split(key)

    inputs = jax.random.normal(k_in, (batch_size, seq_len, input_dim), jnp.float32)
    params = init_params(k_param, input_dim, hidden_dim)
    packed = pack_params(params)          # one-time weight preprocessing

    tags = jax.block_until_ready(
        lstm_tagger_forward(inputs, packed, params["w_fc_row"], params["b_fc"]))
    ref = jax.block_until_ready(reference_forward(inputs, params))

    assert tags.shape == (batch_size, seq_len, 1)
    # Tolerance covers TPU default (reduced) matmul precision, the fused
    # kernel's different f32 summation order, and the tanh(z)=2*sigmoid(2z)-1
    # EUP rounding difference; real bugs (gate order, bias) would be O(0.1).
    assert jnp.allclose(tags, ref, atol=2e-4, rtol=2e-4), \
        float(jnp.max(jnp.abs(tags - ref)))
    print("KERNEL_OK")
</pallas_src>

<mosaic_0001>
module attributes {stable_mosaic.version = 11 : i64} {
  func.func @lstm_tagger_kernel(%arg0: memref<64x16xf32, #tpu.memory_space<vmem>>, %arg1: memref<49x128xf32, #tpu.memory_space<vmem>>, %arg2: memref<1x32xf32, #tpu.memory_space<vmem>>, %arg3: memref<1x1xf32, #tpu.memory_space<smem>>, %arg4: memref<8x8xf32, #tpu.memory_space<vmem>>, %arg5: memref<64x128xf32, #tpu.memory_space<vmem>>, %arg6: memref<8x8x32xf32, #tpu.memory_space<vmem>>) attributes {dimension_semantics = [], scalar_prefetch = 0 : i64, scratch_operands = 2 : i64, tpu.core_type = #tpu.core_type<tc>} {
    %c0 = arith.constant 0 : index
    %c0_0 = arith.constant 0 : index
    %0 = vector.load %arg1[%c0, %c0_0] : memref<49x128xf32, #tpu.memory_space<vmem>>, vector<16x128xf32>
    %c16 = arith.constant 16 : index
    %c0_1 = arith.constant 0 : index
    %1 = vector.load %arg1[%c16, %c0_1] : memref<49x128xf32, #tpu.memory_space<vmem>>, vector<32x128xf32>
    %c48 = arith.constant 48 : index
    %c0_2 = arith.constant 0 : index
    %2 = vector.load %arg1[%c48, %c0_2] : memref<49x128xf32, #tpu.memory_space<vmem>>, vector<1x128xf32>
    %c0_3 = arith.constant 0 : index
    %c0_4 = arith.constant 0 : index
    %3 = vector.load %arg0[%c0_3, %c0_4] : memref<64x16xf32, #tpu.memory_space<vmem>>, vector<64x16xf32>
    %cst = arith.constant dense<0.000000e+00> : vector<64x128xf32>
    %4 = tpu.matmul %3, %0, %cst {dimension_numbers = #tpu.dot_dimension_numbers<[1], [0], [0], [1], [0, 0, 1, 1], [], []>} : vector<64x16xf32>, vector<16x128xf32>, vector<64x128xf32> -> vector<64x128xf32>
    %5 = vector.broadcast %2 : vector<1x128xf32> to vector<64x128xf32>
    %6 = arith.addf %4, %5 : vector<64x128xf32>
    %c0_5 = arith.constant 0 : index
    %c0_6 = arith.constant 0 : index
    %7 = vector.load %arg5[%c0_5, %c0_6] : memref<64x128xf32, #tpu.memory_space<vmem>>, vector<64x128xf32>
    tpu.vector_store %arg5[%c0_5, %c0_6], %6 {strides = array<i32>} : memref<64x128xf32, #tpu.memory_space<vmem>>, vector<64x128xf32>,
    %8 = tpu.iota {dimensions = array<i32: 1>} : vector<8x128xi32>
    %c64_i32 = arith.constant 64 : i32
    %9 = vector.broadcast %c64_i32 : i32 to vector<8x128xi32>
    %10 = arith.cmpi sge, %8, %9 : vector<8x128xi32>
    %c96_i32 = arith.constant 96 : i32
    %11 = vector.broadcast %c96_i32 : i32 to vector<8x128xi32>
    %12 = arith.cmpi slt, %8, %11 : vector<8x128xi32>
    %13 = arith.andi %10, %12 : vector<8x128xi1>
    %cst_7 = arith.constant 2.000000e+00 : f32
    %cst_8 = arith.constant 1.000000e+00 : f32
    %14 = vector.broadcast %cst_7 : f32 to vector<8x128xf32>
    %15 = vector.broadcast %cst_8 : f32 to vector<8x128xf32>
    %16 = arith.select %13, %14, %15 : vector<8x128xi1>, vector<8x128xf32>
    %cst_9 = arith.constant 1.000000e+00 : f32
    %cst_10 = arith.constant 0.000000e+00 : f32
    %17 = vector.broadcast %cst_9 : f32 to vector<8x128xf32>
    %18 = vector.broadcast %cst_10 : f32 to vector<8x128xf32>
    %19 = arith.select %13, %17, %18 : vector<8x128xi1>, vector<8x128xf32>
    %cst_11 = arith.constant 0.000000e+00 : f32
    %20 = vector.broadcast %cst_11 : f32 to vector<8x32xf32>
    %cst_12 = arith.constant 0.000000e+00 : f32
    %21 = vector.broadcast %cst_12 : f32 to vector<8x32xf32>
    %c0_13 = arith.constant 0 : index
    %c0_14 = arith.constant 0 : index
    %22 = vector.load %arg5[%c0_13, %c0_14] : memref<64x128xf32, #tpu.memory_space<vmem>>, vector<8x128xf32>
    %cst_15 = arith.constant dense<0.000000e+00> : vector<8x128xf32>
    %23 = tpu.matmul %20, %1, %cst_15 {dimension_numbers = #tpu.dot_dimension_numbers<[1], [0], [0], [1], [0, 0, 1, 1], [], []>} : vector<8x32xf32>, vector<32x128xf32>, vector<8x128xf32> -> vector<8x128xf32>
    %24 = arith.addf %22, %23 : vector<8x128xf32>
    %25 = arith.negf %24 : vector<8x128xf32>
    %26 = math.exp %25 : vector<8x128xf32>
    %cst_16 = arith.constant 1.000000e+00 : f32
    %27 = vector.broadcast %cst_16 : f32 to vector<8x128xf32>
    %28 = arith.addf %27, %26 : vector<8x128xf32>
    %29 = arith.divf %27, %28 : vector<8x128xf32>
    %30 = arith.mulf %29, %16 : vector<8x128xf32>
    %31 = arith.subf %30, %19 : vector<8x128xf32>
    %32 = vector.extract_strided_slice %31 {offsets = [0, 0], sizes = [8, 32], strides = [1, 1]} : vector<8x128xf32> to vector<8x32xf32>
    %33 = vector.extract_strided_slice %31 {offsets = [0, 32], sizes = [8, 32], strides = [1, 1]} : vector<8x128xf32> to vector<8x32xf32>
    %34 = vector.extract_strided_slice %31 {offsets = [0, 64], sizes = [8, 32], strides = [1, 1]} : vector<8x128xf32> to vector<8x32xf32>
    %35 = vector.extract_strided_slice %31 {offsets = [0, 96], sizes = [8, 32], strides = [1, 1]} : vector<8x128xf32> to vector<8x32xf32>
    %36 = arith.mulf %33, %21 : vector<8x32xf32>
    %37 = arith.mulf %32, %34 : vector<8x32xf32>
    %38 = arith.addf %36, %37 : vector<8x32xf32>
    %39 = math.tanh %38 : vector<8x32xf32>
    %40 = arith.mulf %35, %39 : vector<8x32xf32>
    %c0_17 = arith.constant 0 : index
    %c0_18 = arith.constant 0 : index
    %c0_19 = arith.constant 0 : index
    %41 = vector.load %arg6[%c0_17, %c0_18, %c0_19] : memref<8x8x32xf32, #tpu.memory_space<vmem>>, vector<1x8x32xf32>
    %42 = vector.shape_cast %41 : vector<1x8x32xf32> to vector<8x32xf32>
    %43 = vector.shape_cast %40 : vector<8x32xf32> to vector<1x8x32xf32>
    tpu.vector_store %arg6[%c0_17, %c0_18, %c0_19], %43 {strides = array<i32>} : memref<8x8x32xf32, #tpu.memory_space<vmem>>, vector<1x8x32xf32>,
    %c8 = arith.constant 8 : index
    %c0_20 = arith.constant 0 : index
    %44 = vector.load %arg5[%c8, %c0_20] : memref<64x128xf32, #tpu.memory_space<vmem>>, vector<8x128xf32>
    %cst_21 = arith.constant dense<0.000000e+00> : vector<8x128xf32>
    %45 = tpu.matmul %40, %1, %cst_21 {dimension_numbers = #tpu.dot_dimension_numbers<[1], [0], [0], [1], [0, 0, 1, 1], [], []>} : vector<8x32xf32>, vector<32x128xf32>, vector<8x128xf32> -> vector<8x128xf32>
    %46 = arith.addf %44, %45 : vector<8x128xf32>
    %47 = arith.negf %46 : vector<8x128xf32>
    %48 = math.exp %47 : vector<8x128xf32>
    %cst_22 = arith.constant 1.000000e+00 : f32
    %49 = vector.broadcast %cst_22 : f32 to vector<8x128xf32>
    %50 = arith.addf %49, %48 : vector<8x128xf32>
    %51 = arith.divf %49, %50 : vector<8x128xf32>
    %52 = arith.mulf %51, %16 : vector<8x128xf32>
    %53 = arith.subf %52, %19 : vector<8x128xf32>
    %54 = vector.extract_strided_slice %53 {offsets = [0, 0], sizes = [8, 32], strides = [1, 1]} : vector<8x128xf32> to vector<8x32xf32>
    %55 = vector.extract_strided_slice %53 {offsets = [0, 32], sizes = [8, 32], strides = [1, 1]} : vector<8x128xf32> to vector<8x32xf32>
    %56 = vector.extract_strided_slice %53 {offsets = [0, 64], sizes = [8, 32], strides = [1, 1]} : vector<8x128xf32> to vector<8x32xf32>
    %57 = vector.extract_strided_slice %53 {offsets = [0, 96], sizes = [8, 32], strides = [1, 1]} : vector<8x128xf32> to vector<8x32xf32>
    %58 = arith.mulf %55, %38 : vector<8x32xf32>
    %59 = arith.mulf %54, %56 : vector<8x32xf32>
    %60 = arith.addf %58, %59 : vector<8x32xf32>
    %61 = math.tanh %60 : vector<8x32xf32>
    %62 = arith.mulf %57, %61 : vector<8x32xf32>
    %c1 = arith.constant 1 : index
    %c0_23 = arith.constant 0 : index
    %c0_24 = arith.constant 0 : index
    %63 = vector.load %arg6[%c1, %c0_23, %c0_24] : memref<8x8x32xf32, #tpu.memory_space<vmem>>, vector<1x8x32xf32>
    %64 = vector.shape_cast %63 : vector<1x8x32xf32> to vector<8x32xf32>
    %65 = vector.shape_cast %62 : vector<8x32xf32> to vector<1x8x32xf32>
    tpu.vector_store %arg6[%c1, %c0_23, %c0_24], %65 {strides = array<i32>} : memref<8x8x32xf32, #tpu.memory_space<vmem>>, vector<1x8x32xf32>,
    %c16_25 = arith.constant 16 : index
    %c0_26 = arith.constant 0 : index
    %66 = vector.load %arg5[%c16_25, %c0_26] : memref<64x128xf32, #tpu.memory_space<vmem>>, vector<8x128xf32>
    %cst_27 = arith.constant dense<0.000000e+00> : vector<8x128xf32>
    %67 = tpu.matmul %62, %1, %cst_27 {dimension_numbers = #tpu.dot_dimension_numbers<[1], [0], [0], [1], [0, 0, 1, 1], [], []>} : vector<8x32xf32>, vector<32x128xf32>, vector<8x128xf32> -> vector<8x128xf32>
    %68 = arith.addf %66, %67 : vector<8x128xf32>
    %69 = arith.negf %68 : vector<8x128xf32>
    %70 = math.exp %69 : vector<8x128xf32>
    %cst_28 = arith.constant 1.000000e+00 : f32
    %71 = vector.broadcast %cst_28 : f32 to vector<8x128xf32>
    %72 = arith.addf %71, %70 : vector<8x128xf32>
    %73 = arith.divf %71, %72 : vector<8x128xf32>
    %74 = arith.mulf %73, %16 : vector<8x128xf32>
    %75 = arith.subf %74, %19 : vector<8x128xf32>
    %76 = vector.extract_strided_slice %75 {offsets = [0, 0], sizes = [8, 32], strides = [1, 1]} : vector<8x128xf32> to vector<8x32xf32>
    %77 = vector.extract_strided_slice %75 {offsets = [0, 32], sizes = [8, 32], strides = [1, 1]} : vector<8x128xf32> to vector<8x32xf32>
    %78 = vector.extract_strided_slice %75 {offsets = [0, 64], sizes = [8, 32], strides = [1, 1]} : vector<8x128xf32> to vector<8x32xf32>
    %79 = vector.extract_strided_slice %75 {offsets = [0, 96], sizes = [8, 32], strides = [1, 1]} : vector<8x128xf32> to vector<8x32xf32>
    %80 = arith.mulf %77, %60 : vector<8x32xf32>
    %81 = arith.mulf %76, %78 : vector<8x32xf32>
    %82 = arith.addf %80, %81 : vector<8x32xf32>
    %83 = math.tanh %82 : vector<8x32xf32>
    %84 = arith.mulf %79, %83 : vector<8x32xf32>
    %c2 = arith.constant 2 : index
    %c0_29 = arith.constant 0 : index
    %c0_30 = arith.constant 0 : index
    %85 = vector.load %arg6[%c2, %c0_29, %c0_30] : memref<8x8x32xf32, #tpu.memory_space<vmem>>, vector<1x8x32xf32>
    %86 = vector.shape_cast %85 : vector<1x8x32xf32> to vector<8x32xf32>
    %87 = vector.shape_cast %84 : vector<8x32xf32> to vector<1x8x32xf32>
    tpu.vector_store %arg6[%c2, %c0_29, %c0_30], %87 {strides = array<i32>} : memref<8x8x32xf32, #tpu.memory_space<vmem>>, vector<1x8x32xf32>,
    %c24 = arith.constant 24 : index
    %c0_31 = arith.constant 0 : index
    %88 = vector.load %arg5[%c24, %c0_31] : memref<64x128xf32, #tpu.memory_space<vmem>>, vector<8x128xf32>
    %cst_32 = arith.constant dense<0.000000e+00> : vector<8x128xf32>
    %89 = tpu.matmul %84, %1, %cst_32 {dimension_numbers = #tpu.dot_dimension_numbers<[1], [0], [0], [1], [0, 0, 1, 1], [], []>} : vector<8x32xf32>, vector<32x128xf32>, vector<8x128xf32> -> vector<8x128xf32>
    %90 = arith.addf %88, %89 : vector<8x128xf32>
    %91 = arith.negf %90 : vector<8x128xf32>
    %92 = math.exp %91 : vector<8x128xf32>
    %cst_33 = arith.constant 1.000000e+00 : f32
    %93 = vector.broadcast %cst_33 : f32 to vector<8x128xf32>
    %94 = arith.addf %93, %92 : vector<8x128xf32>
    %95 = arith.divf %93, %94 : vector<8x128xf32>
    %96 = arith.mulf %95, %16 : vector<8x128xf32>
    %97 = arith.subf %96, %19 : vector<8x128xf32>
    %98 = vector.extract_strided_slice %97 {offsets = [0, 0], sizes = [8, 32], strides = [1, 1]} : vector<8x128xf32> to vector<8x32xf32>
    %99 = vector.extract_strided_slice %97 {offsets = [0, 32], sizes = [8, 32], strides = [1, 1]} : vector<8x128xf32> to vector<8x32xf32>
    %100 = vector.extract_strided_slice %97 {offsets = [0, 64], sizes = [8, 32], strides = [1, 1]} : vector<8x128xf32> to vector<8x32xf32>
    %101 = vector.extract_strided_slice %97 {offsets = [0, 96], sizes = [8, 32], strides = [1, 1]} : vector<8x128xf32> to vector<8x32xf32>
    %102 = arith.mulf %99, %82 : vector<8x32xf32>
    %103 = arith.mulf %98, %100 : vector<8x32xf32>
    %104 = arith.addf %102, %103 : vector<8x32xf32>
    %105 = math.tanh %104 : vector<8x32xf32>
    %106 = arith.mulf %101, %105 : vector<8x32xf32>
    %c3 = arith.constant 3 : index
    %c0_34 = arith.constant 0 : index
    %c0_35 = arith.constant 0 : index
    %107 = vector.load %arg6[%c3, %c0_34, %c0_35] : memref<8x8x32xf32, #tpu.memory_space<vmem>>, vector<1x8x32xf32>
    %108 = vector.shape_cast %107 : vector<1x8x32xf32> to vector<8x32xf32>
    %109 = vector.shape_cast %106 : vector<8x32xf32> to vector<1x8x32xf32>
    tpu.vector_store %arg6[%c3, %c0_34, %c0_35], %109 {strides = array<i32>} : memref<8x8x32xf32, #tpu.memory_space<vmem>>, vector<1x8x32xf32>,
    %c32 = arith.constant 32 : index
    %c0_36 = arith.constant 0 : index
    %110 = vector.load %arg5[%c32, %c0_36] : memref<64x128xf32, #tpu.memory_space<vmem>>, vector<8x128xf32>
    %cst_37 = arith.constant dense<0.000000e+00> : vector<8x128xf32>
    %111 = tpu.matmul %106, %1, %cst_37 {dimension_numbers = #tpu.dot_dimension_numbers<[1], [0], [0], [1], [0, 0, 1, 1], [], []>} : vector<8x32xf32>, vector<32x128xf32>, vector<8x128xf32> -> vector<8x128xf32>
    %112 = arith.addf %110, %111 : vector<8x128xf32>
    %113 = arith.negf %112 : vector<8x128xf32>
    %114 = math.exp %113 : vector<8x128xf32>
    %cst_38 = arith.constant 1.000000e+00 : f32
    %115 = vector.broadcast %cst_38 : f32 to vector<8x128xf32>
    %116 = arith.addf %115, %114 : vector<8x128xf32>
    %117 = arith.divf %115, %116 : vector<8x128xf32>
    %118 = arith.mulf %117, %16 : vector<8x128xf32>
    %119 = arith.subf %118, %19 : vector<8x128xf32>
    %120 = vector.extract_strided_slice %119 {offsets = [0, 0], sizes = [8, 32], strides = [1, 1]} : vector<8x128xf32> to vector<8x32xf32>
    %121 = vector.extract_strided_slice %119 {offsets = [0, 32], sizes = [8, 32], strides = [1, 1]} : vector<8x128xf32> to vector<8x32xf32>
    %122 = vector.extract_strided_slice %119 {offsets = [0, 64], sizes = [8, 32], strides = [1, 1]} : vector<8x128xf32> to vector<8x32xf32>
    %123 = vector.extract_strided_slice %119 {offsets = [0, 96], sizes = [8, 32], strides = [1, 1]} : vector<8x128xf32> to vector<8x32xf32>
    %124 = arith.mulf %121, %104 : vector<8x32xf32>
    %125 = arith.mulf %120, %122 : vector<8x32xf32>
    %126 = arith.addf %124, %125 : vector<8x32xf32>
    %127 = math.tanh %126 : vector<8x32xf32>
    %128 = arith.mulf %123, %127 : vector<8x32xf32>
    %c4 = arith.constant 4 : index
    %c0_39 = arith.constant 0 : index
    %c0_40 = arith.constant 0 : index
    %129 = vector.load %arg6[%c4, %c0_39, %c0_40] : memref<8x8x32xf32, #tpu.memory_space<vmem>>, vector<1x8x32xf32>
    %130 = vector.shape_cast %129 : vector<1x8x32xf32> to vector<8x32xf32>
    %131 = vector.shape_cast %128 : vector<8x32xf32> to vector<1x8x32xf32>
    tpu.vector_store %arg6[%c4, %c0_39, %c0_40], %131 {strides = array<i32>} : memref<8x8x32xf32, #tpu.memory_space<vmem>>, vector<1x8x32xf32>,
    %c40 = arith.constant 40 : index
    %c0_41 = arith.constant 0 : index
    %132 = vector.load %arg5[%c40, %c0_41] : memref<64x128xf32, #tpu.memory_space<vmem>>, vector<8x128xf32>
    %cst_42 = arith.constant dense<0.000000e+00> : vector<8x128xf32>
    %133 = tpu.matmul %128, %1, %cst_42 {dimension_numbers = #tpu.dot_dimension_numbers<[1], [0], [0], [1], [0, 0, 1, 1], [], []>} : vector<8x32xf32>, vector<32x128xf32>, vector<8x128xf32> -> vector<8x128xf32>
    %134 = arith.addf %132, %133 : vector<8x128xf32>
    %135 = arith.negf %134 : vector<8x128xf32>
    %136 = math.exp %135 : vector<8x128xf32>
    %cst_43 = arith.constant 1.000000e+00 : f32
    %137 = vector.broadcast %cst_43 : f32 to vector<8x128xf32>
    %138 = arith.addf %137, %136 : vector<8x128xf32>
    %139 = arith.divf %137, %138 : vector<8x128xf32>
    %140 = arith.mulf %139, %16 : vector<8x128xf32>
    %141 = arith.subf %140, %19 : vector<8x128xf32>
    %142 = vector.extract_strided_slice %141 {offsets = [0, 0], sizes = [8, 32], strides = [1, 1]} : vector<8x128xf32> to vector<8x32xf32>
    %143 = vector.extract_strided_slice %141 {offsets = [0, 32], sizes = [8, 32], strides = [1, 1]} : vector<8x128xf32> to vector<8x32xf32>
    %144 = vector.extract_strided_slice %141 {offsets = [0, 64], sizes = [8, 32], strides = [1, 1]} : vector<8x128xf32> to vector<8x32xf32>
    %145 = vector.extract_strided_slice %141 {offsets = [0, 96], sizes = [8, 32], strides = [1, 1]} : vector<8x128xf32> to vector<8x32xf32>
    %146 = arith.mulf %143, %126 : vector<8x32xf32>
    %147 = arith.mulf %142, %144 : vector<8x32xf32>
    %148 = arith.addf %146, %147 : vector<8x32xf32>
    %149 = math.tanh %148 : vector<8x32xf32>
    %150 = arith.mulf %145, %149 : vector<8x32xf32>
    %c5 = arith.constant 5 : index
    %c0_44 = arith.constant 0 : index
    %c0_45 = arith.constant 0 : index
    %151 = vector.load %arg6[%c5, %c0_44, %c0_45] : memref<8x8x32xf32, #tpu.memory_space<vmem>>, vector<1x8x32xf32>
    %152 = vector.shape_cast %151 : vector<1x8x32xf32> to vector<8x32xf32>
    %153 = vector.shape_cast %150 : vector<8x32xf32> to vector<1x8x32xf32>
    tpu.vector_store %arg6[%c5, %c0_44, %c0_45], %153 {strides = array<i32>} : memref<8x8x32xf32, #tpu.memory_space<vmem>>, vector<1x8x32xf32>,
    %c48_46 = arith.constant 48 : index
    %c0_47 = arith.constant 0 : index
    %154 = vector.load %arg5[%c48_46, %c0_47] : memref<64x128xf32, #tpu.memory_space<vmem>>, vector<8x128xf32>
    %cst_48 = arith.constant dense<0.000000e+00> : vector<8x128xf32>
    %155 = tpu.matmul %150, %1, %cst_48 {dimension_numbers = #tpu.dot_dimension_numbers<[1], [0], [0], [1], [0, 0, 1, 1], [], []>} : vector<8x32xf32>, vector<32x128xf32>, vector<8x128xf32> -> vector<8x128xf32>
    %156 = arith.addf %154, %155 : vector<8x128xf32>
    %157 = arith.negf %156 : vector<8x128xf32>
    %158 = math.exp %157 : vector<8x128xf32>
    %cst_49 = arith.constant 1.000000e+00 : f32
    %159 = vector.broadcast %cst_49 : f32 to vector<8x128xf32>
    %160 = arith.addf %159, %158 : vector<8x128xf32>
    %161 = arith.divf %159, %160 : vector<8x128xf32>
    %162 = arith.mulf %161, %16 : vector<8x128xf32>
    %163 = arith.subf %162, %19 : vector<8x128xf32>
    %164 = vector.extract_strided_slice %163 {offsets = [0, 0], sizes = [8, 32], strides = [1, 1]} : vector<8x128xf32> to vector<8x32xf32>
    %165 = vector.extract_strided_slice %163 {offsets = [0, 32], sizes = [8, 32], strides = [1, 1]} : vector<8x128xf32> to vector<8x32xf32>
    %166 = vector.extract_strided_slice %163 {offsets = [0, 64], sizes = [8, 32], strides = [1, 1]} : vector<8x128xf32> to vector<8x32xf32>
    %167 = vector.extract_strided_slice %163 {offsets = [0, 96], sizes = [8, 32], strides = [1, 1]} : vector<8x128xf32> to vector<8x32xf32>
    %168 = arith.mulf %165, %148 : vector<8x32xf32>
    %169 = arith.mulf %164, %166 : vector<8x32xf32>
    %170 = arith.addf %168, %169 : vector<8x32xf32>
    %171 = math.tanh %170 : vector<8x32xf32>
    %172 = arith.mulf %167, %171 : vector<8x32xf32>
    %c6 = arith.constant 6 : index
    %c0_50 = arith.constant 0 : index
    %c0_51 = arith.constant 0 : index
    %173 = vector.load %arg6[%c6, %c0_50, %c0_51] : memref<8x8x32xf32, #tpu.memory_space<vmem>>, vector<1x8x32xf32>
    %174 = vector.shape_cast %173 : vector<1x8x32xf32> to vector<8x32xf32>
    %175 = vector.shape_cast %172 : vector<8x32xf32> to vector<1x8x32xf32>
    tpu.vector_store %arg6[%c6, %c0_50, %c0_51], %175 {strides = array<i32>} : memref<8x8x32xf32, #tpu.memory_space<vmem>>, vector<1x8x32xf32>,
    %c56 = arith.constant 56 : index
    %c0_52 = arith.constant 0 : index
    %176 = vector.load %arg5[%c56, %c0_52] : memref<64x128xf32, #tpu.memory_space<vmem>>, vector<8x128xf32>
    %cst_53 = arith.constant dense<0.000000e+00> : vector<8x128xf32>
    %177 = tpu.matmul %172, %1, %cst_53 {dimension_numbers = #tpu.dot_dimension_numbers<[1], [0], [0], [1], [0, 0, 1, 1], [], []>} : vector<8x32xf32>, vector<32x128xf32>, vector<8x128xf32> -> vector<8x128xf32>
    %178 = arith.addf %176, %177 : vector<8x128xf32>
    %179 = arith.negf %178 : vector<8x128xf32>
    %180 = math.exp %179 : vector<8x128xf32>
    %cst_54 = arith.constant 1.000000e+00 : f32
    %181 = vector.broadcast %cst_54 : f32 to vector<8x128xf32>
    %182 = arith.addf %181, %180 : vector<8x128xf32>
    %183 = arith.divf %181, %182 : vector<8x128xf32>
    %184 = arith.mulf %183, %16 : vector<8x128xf32>
    %185 = arith.subf %184, %19 : vector<8x128xf32>
    %186 = vector.extract_strided_slice %185 {offsets = [0, 0], sizes = [8, 32], strides = [1, 1]} : vector<8x128xf32> to vector<8x32xf32>
    %187 = vector.extract_strided_slice %185 {offsets = [0, 32], sizes = [8, 32], strides = [1, 1]} : vector<8x128xf32> to vector<8x32xf32>
    %188 = vector.extract_strided_slice %185 {offsets = [0, 64], sizes = [8, 32], strides = [1, 1]} : vector<8x128xf32> to vector<8x32xf32>
    %189 = vector.extract_strided_slice %185 {offsets = [0, 96], sizes = [8, 32], strides = [1, 1]} : vector<8x128xf32> to vector<8x32xf32>
    %190 = arith.mulf %187, %170 : vector<8x32xf32>
    %191 = arith.mulf %186, %188 : vector<8x32xf32>
    %192 = arith.addf %190, %191 : vector<8x32xf32>
    %193 = math.tanh %192 : vector<8x32xf32>
    %194 = arith.mulf %189, %193 : vector<8x32xf32>
    %c7 = arith.constant 7 : index
    %c0_55 = arith.constant 0 : index
    %c0_56 = arith.constant 0 : index
    %195 = vector.load %arg6[%c7, %c0_55, %c0_56] : memref<8x8x32xf32, #tpu.memory_space<vmem>>, vector<1x8x32xf32>
    %196 = vector.shape_cast %195 : vector<1x8x32xf32> to vector<8x32xf32>
    %197 = vector.shape_cast %194 : vector<8x32xf32> to vector<1x8x32xf32>
    tpu.vector_store %arg6[%c7, %c0_55, %c0_56], %197 {strides = array<i32>} : memref<8x8x32xf32, #tpu.memory_space<vmem>>, vector<1x8x32xf32>,
    %c0_57 = arith.constant 0 : index
    %c0_58 = arith.constant 0 : index
    %198 = vector.load %arg2[%c0_57, %c0_58] : memref<1x32xf32, #tpu.memory_space<vmem>>, vector<1x32xf32>
    %199 = vector.shape_cast %198 : vector<1x32xf32> to vector<1x1x32xf32>
    %c0_59 = arith.constant 0 : index
    %c0_60 = arith.constant 0 : index
    %c0_61 = arith.constant 0 : index
    %200 = vector.load %arg6[%c0_59, %c0_60, %c0_61] : memref<8x8x32xf32, #tpu.memory_space<vmem>>, vector<8x8x32xf32>
    %201 = vector.broadcast %199 : vector<1x1x32xf32> to vector<8x8x32xf32>
    %202 = arith.mulf %200, %201 : vector<8x8x32xf32>
    %cst_62 = arith.constant dense<0.000000e+00> : vector<8x8xf32>
    %203 = vector.multi_reduction <add>, %202, %cst_62 [2] : vector<8x8x32xf32> to vector<8x8xf32>
    %c0_63 = arith.constant 0 : index
    %c0_64 = arith.constant 0 : index
    %204 = memref.load %arg3[%c0_63, %c0_64] : memref<1x1xf32, #tpu.memory_space<smem>>
    %205 = vector.broadcast %204 : f32 to vector<8x8xf32>
    %206 = arith.addf %203, %205 : vector<8x8xf32>
    %c0_65 = arith.constant 0 : index
    %c0_66 = arith.constant 0 : index
    %207 = vector.load %arg4[%c0_65, %c0_66] : memref<8x8xf32, #tpu.memory_space<vmem>>, vector<8x8xf32>
    tpu.vector_store %arg4[%c0_65, %c0_66], %206 {strides = array<i32>} : memref<8x8xf32, #tpu.memory_space<vmem>>, vector<8x8xf32>,
    return
  }
}

</mosaic_0001>

<bundles_post_ra>
// kernel: lstm_tagger_forward.1
= control target key start
LH: loop header
LB: loop body
LE: loop exit
PB: predicated region body
PF: predicated region fallthrough
CT: control target
= control target key end

     0   :  { %v1426_v0 = vmov 0.0|0.0   ;;  %vm37_vm0 = vcmask 130048   ;;  %vm1427_vm1 = vmmov 0   ;;  %v1428_v4 = vmov 0.0   ;;  %s1431_s7 = smov 32   ;;  %s1677_s1 = inlined_call_operand.vmem [shape: f32[49,128], index: 1, kind: input, shape index: {}]   ;;  %s1678_s0 = inlined_call_operand.vmem [shape: f32[64,16], index: 0, kind: input, shape index: {}]   ;;  %s1679_s2 = inlined_call_operand.vmem [shape: f32[1,32], index: 2, kind: input, shape index: {}]   ;;  %s1680_s3 = inlined_call_operand.<no memory space> [shape: f32[1,1], index: 3, kind: input, shape index: {}]   ;;  %s1681_s4 = inlined_call_operand.vmem [shape: f32[8,8], index: 4, kind: output, shape index: {}]  }
   0x1   :  { %1324 = vmatprep.subr.bf16.mxu1 %v1426_v0  ;;  %v18_v1 = vld [vmem:[%s1677_s1] sm:$0xff]  ;;  %v19_v2 = vld [vmem:[%s1677_s1 + $0x8] sm:$0xff]  ;;  %v20_v3 = vld [vmem:[%s1677_s1 + $0x10] sm:$0xff]  ;;  %1240 = vmatprep.mubr.msk.f32.mxu1 %vm1427_vm1, %v1428_v4  ;;  %v175_v21 = vlaneseq  ;;  %v1429_v25 = vmov 1.0   ;;  %vm183_vm5 = vcmask 261120   ;;  %vm1120_vm6 = vcmask 1041409  }
   0x2   :  { %v21_v5 = vld [vmem:[%s1677_s1 + $0x18] sm:$0xff]  ;;  %v22_v6 = vld [vmem:[%s1677_s1 + $0x20] sm:$0xff]  ;;  %v23_v7 = vld [vmem:[%s1677_s1 + $0x28] sm:$0xff]  ;;  %v1320_v8 = vpack.c.bf16 %v19_v2, %v18_v1  ;;  %vm1122_vm7 = vcmask 1042434   ;;  %vm1124_vm8 = vcmask 1043459   ;;  %vm1126_vm9 = vcmask 1044484  }
   0x3   :  { %v1478_v9 = vpack.c.bf16 %v21_v5, %v20_v3  ;;  %v25_v10 = vld [vmem:[%s1678_s0] sm:$0xff]  ;;  %v1484_v11 = vpack.c.bf16 %v23_v7, %v22_v6  ;;  %v26_v12 = vld [vmem:[%s1678_s0 + $0x8] sm:$0xff]  ;;  %v1509_v13 = vld [vmem:[%s1677_s1 + $0x30] ss:$0 sm:$0xff]  ;;  %v1513_v24 = vand.u32 127, %v175_v21  ;;  %s1430_s1 = smov 64  }
   0x4   :  { %1321 = vmatprep.subr.bf16.mxu0 %v1320_v8  ;;  %1220 = vmatprep.mubr.msk.f32.mxu0 %vm37_vm0, %v25_v10  ;;  %v27_v55 = vld [vmem:[%s1678_s0 + $0x10] sm:$0xff]  ;;  %v28_v56 = vld [vmem:[%s1678_s0 + $0x18] sm:$0xff]  ;;  %v29_v57 = vld [vmem:[%s1678_s0 + $0x20] sm:$0xff]  ;;  %vm1128_vm10 = vcmask 1045509   ;;  %vm1130_vm11 = vcmask 1046534   ;;  %vm1132_vm12 = vcmask 1047559  }
   0x5   :  { %1326 = vmatpush3.bf16.msra.mxu1 %v1478_v9  ;;  %1323 = vmatpush3.bf16.msra.mxu0 %v1320_v8  ;;  %vm177_vm2 = vcmp.ge.s32.totalorder %v1513_v24, 64  ;;  %vm178_vm3 = vcmp.lt.s32.totalorder %v1513_v24, 96  ;;  %v30_v58 = vld [vmem:[%s1678_s0 + $0x28] sm:$0xff]  ;;  %v31_v59 = vld [vmem:[%s1678_s0 + $0x30] sm:$0xff]  ;;  %v32_v60 = vld [vmem:[%s1678_s0 + $0x38] sm:$0xff]  ;;  %vm1135_vm13 = vcmask 64512  }
   0x6   :  { %1327 = vmatprep.subr.bf16.mxu1 %v1426_v0  ;;  %1336 = vmatprep.subr.bf16.mxu0 %v1426_v0  ;;  %vm179_vm4 = vmand %vm177_vm2, %vm178_vm3 }
   0x7   :  { %v1517_v26 = vsel %vm179_vm4, 2.0, %v1429_v25  ;;  %v1520_v28 = vsel %vm179_vm4, 1.0, %v1428_v4 }
   0x8   :  { %1221 = vmatmul.mubr.msk.f32.vlgmr.msra.gmra.mrb[0].mxu0 %vm37_vm0, %v26_v12 }
   0x9   :  { %1329 = vmatpush3.bf16.msra.mxu1 %v1484_v11  ;;  %1338 = vmatpush3.bf16.msra.mxu0 %v1478_v9 }
   0xa   :  { %1330 = vmatprep.subr.bf16.mxu1 %v1426_v0  ;;  %1339 = vmatprep.subr.bf16.mxu0 %v1426_v0 }
   0xb   :  { %1223 = vmatprep.mubr.msk.f32.mxu0 %vm37_vm0, %v27_v55 }
   0xc   :  { %1241 = vmatmul.mubr.f32.vlgmr.msra.gmra.mrb[0].mxu1 %v1428_v4  ;;  %1224 = vmatmul.mubr.msk.f32.gmra.mrb[2].mxu0 %vm37_vm0, %v28_v56 }
   0xd   :  { %1332 = vmatpush3.bf16.msra.mxu1 %v1478_v9  ;;  %1251 = vmatprep.mubr.msk.f32.mxu1 %vm1427_vm1, %v1428_v4 }
   0xe   :  { %1333 = vmatprep.subr.bf16.mxu1 %v1426_v0  ;;  %1341 = vmatpush3.bf16.msra.mxu0 %v1484_v11 }
   0xf   :  { %1348 = vmatprep.subr.bf16.mxu0 %v1426_v0  ;;  %1226 = vmatprep.mubr.msk.f32.mxu0 %vm37_vm0, %v29_v57 }
  0x10   :  { %1227 = vmatmul.mubr.msk.f32.gmra.mrb[4].mxu0 %vm37_vm0, %v30_v58 }
  0x11   :  { %1335 = vmatpush3.bf16.msra.mxu1 %v1484_v11  ;;  %1229 = vmatprep.mubr.msk.f32.mxu0 %vm37_vm0, %v31_v59 }
  0x12   :  { %1342 = vmatprep.subr.bf16.mxu1 %v1426_v0 }
  0x14   :  { %1230 = vmatmul.mubr.msk.f32.gmra.mrb[6].mxu0 %vm37_vm0, %v32_v60 }
  0x15   :  { %1262 = vmatprep.mubr.msk.f32.mxu0 %vm1427_vm1, %v1428_v4 }
  0xdb   :  { %v1222_v14 = vpop.f32.mrb[0].mxu0 }
  0xdc   :  { %v128_v15 = vpop.f32.mrb[1].mxu0  ;;  %v134_v40 = vadd.f32 %v1222_v14, %v1509_v13 }
  0xdd   :  { %v129_v16 = vadd.f32 %v1509_v13, %v128_v15 }
  0xdf   :  { %v253_v17 = vpop.f32.mrb[0].mxu1  ;;  %v1225_v1 = vpop.f32.mrb[2].mxu0 }
  0xe0   :  { %v257_v18 = vadd.f32 %v253_v17, %v129_v16  ;;  %v1242_v19 = vpop.f32.mrb[1].mxu1  ;;  %v138_v2 = vpop.f32.mrb[3].mxu0 }
  0xe1   :  { %v139_v10 = vadd.f32 %v1509_v13, %v138_v2 }
  0xe2   :  { %v1150_v20 = vmul.f32 -1.442695, %v257_v18 }
  0xe3   :  { %v1569_v3 = vpop.f32.mrb[4].mxu0 }
  0xe4   :  { %1378 = vpow2.f32 %v1150_v20  ;;  %v1571_v5 = vpop.f32.mrb[5].mxu0 }
  0xe7   :  { %v1573_v6 = vpop.f32.mrb[6].mxu0 }
  0xe8   :  { %v1575_v7 = vpop.f32.mrb[7].mxu0 }
  0xee   :  { %v1379_v22 = vpop.eup %1378 }
  0xef   :  { %v261_v23 = vadd.f32 1.0, %v1379_v22 }
  0xf1   :  { %1380 = vrcp.f32 %v261_v23 }
  0xfb   :  { %v1381_v27 = vpop.eup %1380 }
  0xfc   :  { %v264_v29 = vmul.f32 %v1381_v27, %v1517_v26 }
  0xfe   :  { %v265_v30 = vsub.f32 %v264_v29, %v1520_v28 }
 0x100   :  { %268 = vrot.lane.b32.xlu0 %v265_v30, %s1430_s1  ;;  %v266_v33 = vmul.f32 0.0, %v265_v30 }
 0x172   :  { %v269_v31 = vpop.permute.xlu0 %268 }
 0x173   :  { %v271_v32 = vmul.f32 %v269_v31, %v265_v30 }
 0x175   :  { %273 = vrot.lane.b32.xlu0 %v271_v32, %s1431_s7 }
 0x1e7   :  { %v274_v34 = vpop.permute.xlu0 %273 }
 0x1e8   :  { %v276_v35 = vadd.f32 %v274_v34, %v266_v33 }
 0x1ea   :  { %1382 = vtanh.f32 %v276_v35 }
 0x1f4   :  { %v1383_v36 = vpop.eup %1382 }
 0x1f5   :  { %279 = vrot.lane.b32.xlu1 %v1383_v36, %s1430_s1 }
 0x267   :  { %v280_v37 = vpop.permute.xlu1 %279 }
 0x268   :  { %v282_v38 = vmul.f32 %v280_v37, %v265_v30 }
 0x26a   :  { %284 = vrot.lane.b32.xlu1 %v282_v38, %s1431_s7 }
 0x2dc   :  { %v285_v39 = vpop.permute.xlu1 %284 }
 0x2dd   :  { %287 = vst.msk [vmem:[#allocation3] sm:$0xff] %vm183_vm5, %v285_v39  ;;  %1252 = vmatmul.mubr.msk.f32.vlgmr.msra.gmra.mrb[2].mxu1 %vm183_vm5, %v285_v39 }
 0x2de   :  { %1344 = vmatpush3.bf16.msra.mxu1 %v1478_v9  ;;  %1273 = vmatprep.mubr.msk.f32.mxu1 %vm1427_vm1, %v1428_v4 }
 0x2df   :  { %1345 = vmatprep.subr.bf16.mxu1 %v1426_v0 }
 0x2e2   :  { %1347 = vmatpush3.bf16.msra.mxu1 %v1484_v11 }
 0x2e3   :  { %1354 = vmatprep.subr.bf16.mxu1 %v1426_v0 }
 0x3b0   :  { %v357_v41 = vpop.f32.mrb[2].mxu1 }
 0x3b1   :  { %v361_v42 = vadd.f32 %v357_v41, %v134_v40  ;;  %v1253_v43 = vpop.f32.mrb[3].mxu1 }
 0x3b3   :  { %v1152_v44 = vmul.f32 -1.442695, %v361_v42 }
 0x3b5   :  { %1384 = vpow2.f32 %v1152_v44 }
 0x3bf   :  { %v1385_v45 = vpop.eup %1384 }
 0x3c0   :  { %v365_v46 = vadd.f32 1.0, %v1385_v45 }
 0x3c2   :  { %1386 = vrcp.f32 %v365_v46 }
 0x3cc   :  { %v1387_v47 = vpop.eup %1386 }
 0x3cd   :  { %v368_v48 = vmul.f32 %v1387_v47, %v1517_v26 }
 0x3cf   :  { %v369_v49 = vsub.f32 %v368_v48, %v1520_v28 }
 0x3d1   :  { %372 = vrot.lane.b32.xlu0 %v369_v49, %s1430_s1  ;;  %v370_v52 = vmul.f32 %v369_v49, %v276_v35  ;;  %v144_v35 = vadd.f32 %v1225_v1, %v1509_v13 }
 0x443   :  { %v373_v50 = vpop.permute.xlu0 %372 }
 0x444   :  { %v375_v51 = vmul.f32 %v373_v50, %v369_v49 }
 0x446   :  { %377 = vrot.lane.b32.xlu1 %v375_v51, %s1431_s7 }
 0x4b8   :  { %v378_v53 = vpop.permute.xlu1 %377 }
 0x4b9   :  { %v380_v54 = vadd.f32 %v378_v53, %v370_v52 }
 0x4bb   :  { %1388 = vtanh.f32 %v380_v54 }
 0x4c5   :  { %v1389_v61 = vpop.eup %1388 }
 0x4c6   :  { %383 = vrot.lane.b32.xlu0 %v1389_v61, %s1430_s1 }
 0x538   :  { %v384_v62 = vpop.permute.xlu0 %383 }
 0x539   :  { %v386_v63 = vmul.f32 %v384_v62, %v369_v49 }
 0x53b   :  { %388 = vrot.lane.b32.xlu1 %v386_v63, %s1431_s7 }
 0x5ad   :  { %v389_v8 = vpop.permute.xlu1 %388 }
 0x5ae   :  { %392 = vst.msk [vmem:[#allocation3 + $0x8] sm:$0xff] %vm183_vm5, %v389_v8  ;;  %1263 = vmatmul.mubr.msk.f32.vlgmr.msra.gmra.mrb[8].mxu0 %vm183_vm5, %v389_v8 }
 0x5af   :  { %1350 = vmatpush3.bf16.msra.mxu0 %v1478_v9  ;;  %1284 = vmatprep.mubr.msk.f32.mxu0 %vm1427_vm1, %v1428_v4 }
 0x5b0   :  { %1351 = vmatprep.subr.bf16.mxu0 %v1426_v0 }
 0x5b3   :  { %1353 = vmatpush3.bf16.msra.mxu0 %v1484_v11 }
 0x5b4   :  { %1360 = vmatprep.subr.bf16.mxu0 %v1426_v0 }
 0x681   :  { %v462_v12 = vpop.f32.mrb[8].mxu0 }
 0x682   :  { %v466_v14 = vadd.f32 %v462_v12, %v139_v10  ;;  %v1264_v15 = vpop.f32.mrb[9].mxu0 }
 0x684   :  { %v1154_v16 = vmul.f32 -1.442695, %v466_v14 }
 0x686   :  { %1390 = vpow2.f32 %v1154_v16 }
 0x690   :  { %v1391_v17 = vpop.eup %1390 }
 0x691   :  { %v470_v18 = vadd.f32 1.0, %v1391_v17  ;;  %v154_v17 = vadd.f32 %v1569_v3, %v1509_v13 }
 0x693   :  { %1392 = vrcp.f32 %v470_v18 }
 0x69d   :  { %v1393_v19 = vpop.eup %1392 }
 0x69e   :  { %v473_v20 = vmul.f32 %v1393_v19, %v1517_v26 }
 0x6a0   :  { %v474_v22 = vsub.f32 %v473_v20, %v1520_v28 }
 0x6a2   :  { %477 = vrot.lane.b32.xlu0 %v474_v22, %s1430_s1  ;;  %v475_v27 = vmul.f32 %v474_v22, %v380_v54  ;;  %v149_v54 = vadd.f32 %v1509_v13, %v1571_v5 }
 0x714   :  { %v478_v23 = vpop.permute.xlu0 %477 }
 0x715   :  { %v480_v25 = vmul.f32 %v478_v23, %v474_v22 }
 0x717   :  { %482 = vrot.lane.b32.xlu1 %v480_v25, %s1431_s7 }
 0x789   :  { %v483_v29 = vpop.permute.xlu1 %482 }
 0x78a   :  { %v485_v30 = vadd.f32 %v483_v29, %v475_v27 }
 0x78c   :  { %1394 = vtanh.f32 %v485_v30 }
 0x796   :  { %v1395_v31 = vpop.eup %1394 }
 0x797   :  { %488 = vrot.lane.b32.xlu0 %v1395_v31, %s1430_s1 }
 0x809   :  { %v489_v32 = vpop.permute.xlu0 %488 }
 0x80a   :  { %v491_v33 = vmul.f32 %v489_v32, %v474_v22 }
 0x80c   :  { %493 = vrot.lane.b32.xlu1 %v491_v33, %s1431_s7 }
 0x87e   :  { %v494_v34 = vpop.permute.xlu1 %493 }
 0x87f   :  { %497 = vst.msk [vmem:[#allocation3 + $0x10] sm:$0xff] %vm183_vm5, %v494_v34  ;;  %1274 = vmatmul.mubr.msk.f32.vlgmr.msra.gmra.mrb[4].mxu1 %vm183_vm5, %v494_v34 }
 0x880   :  { %1356 = vmatpush3.bf16.msra.mxu1 %v1478_v9  ;;  %1295 = vmatprep.mubr.msk.f32.mxu1 %vm1427_vm1, %v1428_v4 }
 0x881   :  { %1357 = vmatprep.subr.bf16.mxu1 %v1426_v0 }
 0x884   :  { %1359 = vmatpush3.bf16.msra.mxu1 %v1484_v11 }
 0x885   :  { %1366 = vmatprep.subr.bf16.mxu1 %v1426_v0 }
 0x952   :  { %v567_v36 = vpop.f32.mrb[4].mxu1 }
 0x953   :  { %v571_v37 = vadd.f32 %v567_v36, %v144_v35  ;;  %v1275_v38 = vpop.f32.mrb[5].mxu1  ;;  %v159_v35 = vadd.f32 %v1509_v13, %v1575_v7 }
 0x955   :  { %v1156_v39 = vmul.f32 -1.442695, %v571_v37 }
 0x957   :  { %1396 = vpow2.f32 %v1156_v39 }
 0x961   :  { %v1397_v40 = vpop.eup %1396 }
 0x962   :  { %v575_v41 = vadd.f32 1.0, %v1397_v40 }
 0x964   :  { %1398 = vrcp.f32 %v575_v41 }
 0x96e   :  { %v1399_v42 = vpop.eup %1398 }
 0x96f   :  { %v578_v43 = vmul.f32 %v1399_v42, %v1517_v26 }
 0x971   :  { %v579_v44 = vsub.f32 %v578_v43, %v1520_v28 }
 0x973   :  { %582 = vrot.lane.b32.xlu0 %v579_v44, %s1430_s1  ;;  %v580_v47 = vmul.f32 %v579_v44, %v485_v30 }
 0x9e5   :  { %v583_v45 = vpop.permute.xlu0 %582 }
 0x9e6   :  { %v585_v46 = vmul.f32 %v583_v45, %v579_v44 }
 0x9e8   :  { %587 = vrot.lane.b32.xlu1 %v585_v46, %s1431_s7 }
 0xa5a   :  { %v588_v48 = vpop.permute.xlu1 %587 }
 0xa5b   :  { %v590_v49 = vadd.f32 %v588_v48, %v580_v47 }
 0xa5d   :  { %1400 = vtanh.f32 %v590_v49 }
 0xa67   :  { %v1401_v50 = vpop.eup %1400 }
 0xa68   :  { %593 = vrot.lane.b32.xlu0 %v1401_v50, %s1430_s1 }
 0xada   :  { %v594_v51 = vpop.permute.xlu0 %593 }
 0xadb   :  { %v596_v52 = vmul.f32 %v594_v51, %v579_v44 }
 0xadd   :  { %598 = vrot.lane.b32.xlu1 %v596_v52, %s1431_s7 }
 0xb4f   :  { %v599_v53 = vpop.permute.xlu1 %598 }
 0xb50   :  { %602 = vst.msk [vmem:[#allocation3 + $0x18] sm:$0xff] %vm183_vm5, %v599_v53  ;;  %1285 = vmatmul.mubr.msk.f32.vlgmr.msra.gmra.mrb[10].mxu0 %vm183_vm5, %v599_v53  ;;  %v164_v53 = vadd.f32 %v1573_v6, %v1509_v13 }
 0xb51   :  { %1362 = vmatpush3.bf16.msra.mxu0 %v1478_v9  ;;  %1306 = vmatprep.mubr.msk.f32.mxu0 %vm1427_vm1, %v1428_v4 }
 0xb52   :  { %1363 = vmatprep.subr.bf16.mxu0 %v1426_v0 }
 0xb55   :  { %1365 = vmatpush3.bf16.msra.mxu0 %v1484_v11 }
 0xc23   :  { %v672_v55 = vpop.f32.mrb[10].mxu0 }
 0xc24   :  { %v676_v56 = vadd.f32 %v672_v55, %v149_v54  ;;  %v1286_v57 = vpop.f32.mrb[11].mxu0 }
 0xc26   :  { %v1158_v58 = vmul.f32 -1.442695, %v676_v56 }
 0xc28   :  { %1402 = vpow2.f32 %v1158_v58 }
 0xc32   :  { %v1403_v59 = vpop.eup %1402 }
 0xc33   :  { %v680_v60 = vadd.f32 1.0, %v1403_v59 }
 0xc35   :  { %1404 = vrcp.f32 %v680_v60 }
 0xc3f   :  { %v1405_v61 = vpop.eup %1404 }
 0xc40   :  { %v683_v62 = vmul.f32 %v1405_v61, %v1517_v26 }
 0xc42   :  { %v684_v63 = vsub.f32 %v683_v62, %v1520_v28 }
 0xc44   :  { %687 = vrot.lane.b32.xlu0 %v684_v63, %s1430_s1  ;;  %v685_v5 = vmul.f32 %v684_v63, %v590_v49 }
 0xcb6   :  { %v688_v1 = vpop.permute.xlu0 %687 }
 0xcb7   :  { %v690_v2 = vmul.f32 %v688_v1, %v684_v63 }
 0xcb9   :  { %692 = vrot.lane.b32.xlu1 %v690_v2, %s1431_s7 }
 0xd2b   :  { %v693_v8 = vpop.permute.xlu1 %692 }
 0xd2c   :  { %v695_v10 = vadd.f32 %v693_v8, %v685_v5  ;;  %v1165_v8 = vld [vmem:[%s1679_s2] ss:$0 sm:$0xff] }
 0xd2e   :  { %1406 = vtanh.f32 %v695_v10 }
 0xd38   :  { %v1407_v12 = vpop.eup %1406 }
 0xd39   :  { %698 = vrot.lane.b32.xlu0 %v1407_v12, %s1430_s1 }
 0xdab   :  { %v699_v14 = vpop.permute.xlu0 %698 }
 0xdac   :  { %v701_v15 = vmul.f32 %v699_v14, %v684_v63 }
 0xdae   :  { %703 = vrot.lane.b32.xlu1 %v701_v15, %s1431_s7  ;;  %v1027_v15 = vld [vmem:[#allocation3 + $0x18] sm:$0xff] }
 0xe20   :  { %v704_v16 = vpop.permute.xlu1 %703 }
 0xe21   :  { %707 = vst.msk [vmem:[#allocation3 + $0x20] sm:$0xff] %vm183_vm5, %v704_v16  ;;  %1296 = vmatmul.mubr.msk.f32.vlgmr.msra.gmra.mrb[6].mxu1 %vm183_vm5, %v704_v16 }
 0xe22   :  { %1368 = vmatpush3.bf16.msra.mxu1 %v1478_v9  ;;  %1317 = vmatprep.mubr.msk.f32.mxu1 %vm1427_vm1, %v1428_v4 }
 0xe23   :  { %1369 = vmatprep.subr.bf16.mxu1 %v1426_v0 }
 0xe26   :  { %1371 = vmatpush3.bf16.msra.mxu1 %v1484_v11 }
 0xef4   :  { %v777_v18 = vpop.f32.mrb[6].mxu1 }
 0xef5   :  { %v781_v19 = vadd.f32 %v777_v18, %v154_v17  ;;  %v1297_v20 = vpop.f32.mrb[7].mxu1  ;;  %v1041_v17 = vmul.f32 %v1165_v8, %v1027_v15 }
 0xef7   :  { %v1160_v22 = vmul.f32 -1.442695, %v781_v19  ;;  %v1055_v19 = vsel %vm183_vm5, %v1041_v17, 0.0 }
 0xef9   :  { %1408 = vpow2.f32 %v1160_v22 }
 0xf03   :  { %v1409_v23 = vpop.eup %1408 }
 0xf04   :  { %v785_v25 = vadd.f32 1.0, %v1409_v23 }
 0xf06   :  { %1410 = vrcp.f32 %v785_v25 }
 0xf10   :  { %v1411_v27 = vpop.eup %1410 }
 0xf11   :  { %v788_v9 = vmul.f32 %v1411_v27, %v1517_v26  ;;  %v1025_v27 = vld [vmem:[#allocation3 + $0x8] sm:$0xff] }
 0xf13   :  { %v789_v4 = vsub.f32 %v788_v9, %v1520_v28  ;;  %v1039_v9 = vmul.f32 %v1165_v8, %v1025_v27 }
 0xf15   :  { %792 = vrot.lane.b32.xlu0 %v789_v4, %s1430_s1  ;;  %v790_v3 = vmul.f32 %v789_v4, %v695_v10 }
 0xf87   :  { %v793_v0 = vpop.permute.xlu0 %792 }
 0xf88   :  { %v795_v11 = vmul.f32 %v793_v0, %v789_v4  ;;  %v1049_v0 = vsel %vm183_vm5, %v1039_v9, 0.0 }
 0xf8a   :  { %797 = vrot.lane.b32.xlu1 %v795_v11, %s1431_s7 }
 0xffc   :  { %v798_v29 = vpop.permute.xlu1 %797 }
 0xffd   :  { %v800_v30 = vadd.f32 %v798_v29, %v790_v3 }
 0xfff   :  { %1412 = vtanh.f32 %v800_v30 }
0x1009   :  { %v1413_v31 = vpop.eup %1412 }
0x100a   :  { %803 = vrot.lane.b32.xlu0 %v1413_v31, %s1430_s1 }
0x107c   :  { %v804_v32 = vpop.permute.xlu0 %803 }
0x107d   :  { %v806_v33 = vmul.f32 %v804_v32, %v789_v4  ;;  %v1028_v4 = vld [vmem:[#allocation3 + $0x20] sm:$0xff] }
0x107e   :  { %v1042_v11 = vmul.f32 %v1165_v8, %v1028_v4 }
0x107f   :  { %808 = vrot.lane.b32.xlu1 %v806_v33, %s1431_s7 }
0x1080   :  { %v1058_v29 = vsel %vm183_vm5, %v1042_v11, 0.0 }
0x10f1   :  { %v809_v34 = vpop.permute.xlu1 %808 }
0x10f2   :  { %812 = vst.msk [vmem:[#allocation3 + $0x28] sm:$0xff] %vm183_vm5, %v809_v34  ;;  %1307 = vmatmul.mubr.msk.f32.vlgmr.msra.gmra.mrb[12].mxu0 %vm183_vm5, %v809_v34 }
0x10f9   :  { %v1029_v18 = vld [vmem:[#allocation3 + $0x28] sm:$0xff] }
0x10fa   :  { %v1043_v20 = vmul.f32 %v1165_v8, %v1029_v18 }
0x10fc   :  { %v1061_v22 = vsel %vm183_vm5, %v1043_v20, 0.0 }
0x11c5   :  { %v882_v36 = vpop.f32.mrb[12].mxu0 }
0x11c6   :  { %v886_v37 = vadd.f32 %v882_v36, %v159_v35  ;;  %v1308_v38 = vpop.f32.mrb[13].mxu0 }
0x11c7   :  { %v1089_v38 = vshrl.u32 %v175_v21, 7 }
0x11c8   :  { %v1162_v39 = vmul.f32 -1.442695, %v886_v37 }
0x11ca   :  { %1414 = vpow2.f32 %v1162_v39  ;;  %v1071_v39 = vstv %s1680_s3 }
0x11d4   :  { %v1415_v40 = vpop.eup %1414 }
0x11d5   :  { %v890_v41 = vadd.f32 1.0, %v1415_v40 }
0x11d7   :  { %1416 = vrcp.f32 %v890_v41 }
0x11e1   :  { %v1417_v42 = vpop.eup %1416 }
0x11e2   :  { %v893_v43 = vmul.f32 %v1417_v42, %v1517_v26  ;;  %v1090_v42 = vsub.s32 %v1513_v24, %v1089_v38 }
0x11e4   :  { %v894_v44 = vsub.f32 %v893_v43, %v1520_v28 }
0x11e6   :  { %897 = vrot.lane.b32.xlu0 %v894_v44, %s1430_s1  ;;  %v895_v7 = vmul.f32 %v894_v44, %v800_v30 }
0x1258   :  { %v898_v45 = vpop.permute.xlu0 %897 }
0x1259   :  { %v900_v46 = vmul.f32 %v898_v45, %v894_v44 }
0x125b   :  { %902 = vrot.lane.b32.xlu1 %v900_v46, %s1431_s7 }
0x12cd   :  { %v903_v47 = vpop.permute.xlu1 %902 }
0x12ce   :  { %v905_v48 = vadd.f32 %v903_v47, %v895_v7 }
0x12d0   :  { %1418 = vtanh.f32 %v905_v48 }
0x12da   :  { %v1419_v49 = vpop.eup %1418 }
0x12db   :  { %908 = vrot.lane.b32.xlu0 %v1419_v49, %s1430_s1 }
0x134d   :  { %v909_v50 = vpop.permute.xlu0 %908 }
0x134e   :  { %v911_v51 = vmul.f32 %v909_v50, %v894_v44 }
0x1350   :  { %913 = vrot.lane.b32.xlu1 %v911_v51, %s1431_s7 }
0x13c2   :  { %v914_v52 = vpop.permute.xlu1 %913 }
0x13c3   :  { %917 = vst.msk [vmem:[#allocation3 + $0x30] sm:$0xff] %vm183_vm5, %v914_v52  ;;  %1318 = vmatmul.mubr.msk.f32.vlgmr.msra.gmra.mrb[8].mxu1 %vm183_vm5, %v914_v52 }
0x13ca   :  { %v1030_v3 = vld [vmem:[#allocation3 + $0x30] sm:$0xff] }
0x13cb   :  { %v1044_v30 = vmul.f32 %v1165_v8, %v1030_v3 }
0x13cd   :  { %v1064_v31 = vsel %vm183_vm5, %v1044_v30, 0.0 }
0x1496   :  { %v987_v54 = vpop.f32.mrb[8].mxu1 }
0x1497   :  { %v991_v55 = vadd.f32 %v987_v54, %v164_v53  ;;  %v1319_v56 = vpop.f32.mrb[9].mxu1 }
0x1499   :  { %v1164_v57 = vmul.f32 -1.442695, %v991_v55 }
0x149b   :  { %1420 = vpow2.f32 %v1164_v57 }
0x14a5   :  { %v1421_v58 = vpop.eup %1420 }
0x14a6   :  { %v995_v59 = vadd.f32 1.0, %v1421_v58 }
0x14a8   :  { %1422 = vrcp.f32 %v995_v59 }
0x14b2   :  { %v1423_v60 = vpop.eup %1422 }
0x14b3   :  { %v998_v61 = vmul.f32 %v1423_v60, %v1517_v26  ;;  %v1024_v26 = vld [vmem:[#allocation3] sm:$0xff] }
0x14b4   :  { %v1038_v10 = vmul.f32 %v1165_v8, %v1024_v26 }
0x14b5   :  { %v999_v62 = vsub.f32 %v998_v61, %v1520_v28  ;;  %v1026_v28 = vld [vmem:[#allocation3 + $0x10] sm:$0xff] }
0x14b6   :  { %v1046_v12 = vsel %vm183_vm5, %v1038_v10, 0.0  ;;  %v1040_v14 = vmul.f32 %v1165_v8, %v1026_v28 }
0x14b7   :  { %1002 = vrot.lane.b32.xlu0 %v999_v62, %s1430_s1  ;;  %v1000_v13 = vmul.f32 %v999_v62, %v905_v48 }
0x14b8   :  { %v1052_v16 = vsel %vm183_vm5, %v1040_v14, 0.0 }
0x1529   :  { %v1003_v63 = vpop.permute.xlu0 %1002 }
0x152a   :  { %v1005_v1 = vmul.f32 %v1003_v63, %v999_v62 }
0x152c   :  { %1007 = vrot.lane.b32.xlu1 %v1005_v1, %s1431_s7 }
0x159e   :  { %v1008_v6 = vpop.permute.xlu1 %1007 }
0x159f   :  { %v1010_v2 = vadd.f32 %v1008_v6, %v1000_v13 }
0x15a1   :  { %1424 = vtanh.f32 %v1010_v2 }
0x15ab   :  { %v1425_v5 = vpop.eup %1424 }
0x15ac   :  { %1013 = vrot.lane.b32.xlu0 %v1425_v5, %s1430_s1 }
0x15cb   :  { %1047 = vadd.xlane.f32.xlu0 %v1046_v12 }
0x15cf   :  { %1053 = vadd.xlane.f32.xlu0 %v1052_v16 }
0x15d3   :  { %1056 = vadd.xlane.f32.xlu0 %v1055_v19 }
0x15d7   :  { %1062 = vadd.xlane.f32.xlu0 %v1061_v22 }
0x161e   :  { %v1014_v23 = vpop.permute.xlu0 %1013 }
0x161f   :  { %v1016_v25 = vmul.f32 %v1014_v23, %v999_v62 }
0x1621   :  { %1018 = vrot.lane.b32.xlu1 %v1016_v25, %s1431_s7 }
0x1645   :  { %1050 = vadd.xlane.f32.xlu1 %v1049_v0 }
0x1649   :  { %1059 = vadd.xlane.f32.xlu1 %v1058_v29 }
0x164d   :  { %1065 = vadd.xlane.f32.xlu1 %v1064_v31 }
0x1658   :  { %v1048_v36 = vpop.xlane.xlu0 %1047 }
0x1659   :  { %v1072_v43 = vadd.f32 %v1071_v39, %v1048_v36 }
0x165b   :  { %v1091_v47 = vrot.slane %v1072_v43, %v1090_v42 }
0x165c   :  { %v1054_v40 = vpop.xlane.xlu0 %1053 }
0x165d   :  { %v1074_v46 = vadd.f32 %v1071_v39, %v1054_v40 }
0x165f   :  { %v1099_v50 = vrot.slane %v1074_v46, %v1090_v42 }
0x1660   :  { %v1057_v7 = vpop.xlane.xlu0 %1056 }
0x1661   :  { %v1075_v48 = vadd.f32 %v1071_v39, %v1057_v7 }
0x1663   :  { %v1103_v54 = vrot.slane %v1075_v48, %v1090_v42 }
0x1664   :  { %v1063_v52 = vpop.xlane.xlu0 %1062 }
0x1665   :  { %v1077_v24 = vadd.f32 %v1071_v39, %v1063_v52 }
0x1667   :  { %v1111_v61 = vrot.slane %v1077_v24, %v1090_v42 }
0x1693   :  { %v1019_v32 = vpop.permute.xlu1 %1018 }
0x1694   :  { %1022 = vst.msk [vmem:[#allocation3 + $0x38] sm:$0xff] %vm183_vm5, %v1019_v32 }
0x169b   :  { %v1031_v33 = vld [vmem:[#allocation3 + $0x38] sm:$0xff] }
0x169c   :  { %v1045_v34 = vmul.f32 %v1165_v8, %v1031_v33 }
0x169e   :  { %v1067_v35 = vsel %vm183_vm5, %v1045_v34, 0.0 }
0x169f   :  { %1068 = vadd.xlane.f32.xlu0 %v1067_v35 }
0x16d2   :  { %v1051_v37 = vpop.xlane.xlu1 %1050 }
0x16d3   :  { %v1073_v41 = vadd.f32 %v1071_v39, %v1051_v37 }
0x16d5   :  { %v1095_v44 = vrot.slane %v1073_v41, %v1090_v42 }
0x16d6   :  { %v1060_v45 = vpop.xlane.xlu1 %1059 }
0x16d7   :  { %v1121_v49 = vsel %vm1120_vm6, %v1095_v44, %v1091_v47  ;;  %v1076_v21 = vadd.f32 %v1071_v39, %v1060_v45 }
0x16d8   :  { %v1123_v53 = vsel %vm1122_vm7, %v1099_v50, %v1121_v49 }
0x16d9   :  { %v1107_v55 = vrot.slane %v1076_v21, %v1090_v42  ;;  %v1125_v57 = vsel %vm1124_vm8, %v1103_v54, %v1123_v53 }
0x16da   :  { %v1066_v51 = vpop.xlane.xlu1 %1065 }
0x16db   :  { %v1078_v56 = vadd.f32 %v1071_v39, %v1066_v51  ;;  %v1127_v58 = vsel %vm1126_vm9, %v1107_v55, %v1125_v57 }
0x16dc   :  { %v1129_v63 = vsel %vm1128_vm10, %v1111_v61, %v1127_v58 }
0x16dd   :  { %v1115_v59 = vrot.slane %v1078_v56, %v1090_v42 }
0x16df   :  { %v1131_v13 = vsel %vm1130_vm11, %v1115_v59, %v1129_v63 }
0x172c   :  { %v1069_v60 = vpop.xlane.xlu0 %1068 }
0x172d   :  { %v1079_v62 = vadd.f32 %v1071_v39, %v1069_v60 }
0x172f   :  { %v1119_v1 = vrot.slane %v1079_v62, %v1090_v42 }
0x1731   :  { %v1133_v6 = vsel %vm1132_vm12, %v1119_v1, %v1131_v13 }
0x1732   :  { %1136 = vst.msk [vmem:[%s1681_s4] sm:$0xff] %vm1135_vm13, %v1133_v6 }

</bundles_post_ra>
